<compile_context>
chip_gen: v6e
topology: v6e:2x2x1
jax: 0.10.0
libtpu: 0.0.40
codegen_flags: <defaults>
</compile_context>

<pallas_src>
import functools

import jax
import jax.numpy as jnp
from jax import lax
from jax.experimental import pallas as pl
from jax.experimental.pallas import tpu as pltpu


def _sim_threshold_kernel(l_ref, rt_ref, o_ref, *, threshold):
    # Pure MXU tile: (TM, K) @ (K, TN) in native layout, then threshold.
    s = jnp.dot(l_ref[...], rt_ref[...], preferred_element_type=jnp.float32)
    o_ref[...] = jnp.where(s < threshold, 0.0, s).astype(o_ref.dtype)


def _round_up(x, m):
    return (x + m - 1) // m * m


def _normalized_features(h_pad, weights, eps):
    """Prologue (O(N*C*dim)): per-channel weighting + row L2 normalization.

    Returns:
      left    : (N_pad, K) normalized features with 1/C folded in   (LHS)
      right_t : (K, N_pad) normalized features, transposed          (RHS)
    with K = num_channel * dim.  Requires eps > 0 so zero / padded rows
    normalize to exact zero vectors (no 0 * inf).
    """
    num_channel, dim = weights.shape
    n_pad = h_pad.shape[0]
    k = num_channel * dim

    hw = h_pad[None, :, :] * weights[:, None, :]            # (C, N_pad, dim)
    ss = jnp.sum(hw * hw, axis=-1, keepdims=True)           # (C, N_pad, 1)
    # 1 / max(||hw||, eps)  ==  rsqrt(max(sum_sq, eps^2))
    inv = lax.rsqrt(jnp.maximum(ss, eps * eps))
    hn = hw * inv                                            # (C, N_pad, dim)

    left = jnp.transpose(hn, (1, 0, 2)).reshape(n_pad, k) * (1.0 / num_channel)
    right_t = jnp.transpose(hn, (0, 2, 1)).reshape(k, n_pad)
    return left, right_t


@functools.partial(jax.jit, static_argnames=("threshold", "eps", "block"))
def graph_generator(h, weights, *, threshold=0.1, eps=1e-8, block=1024):
    """h: (N, dim) f32, weights: (num_channel, dim) f32 -> (N, N) f32."""
    n, dim = h.shape
    num_channel = weights.shape[0]
    k = num_channel * dim

    # Pad N so output tiles are lane-dense (multiple of 128) and the grid
    # divides evenly.  TILE is capped at `block` (default 1024: safe on v7x's
    # 64 MiB VMEM, still large enough to amortize per-step overhead).
    n_pad = _round_up(max(n, 1), 128)
    tile = min(block, n_pad)
    n_pad = _round_up(n_pad, tile)
    if n_pad != n:
        h = jnp.pad(h, ((0, n_pad - n), (0, 0)))

    left, right_t = _normalized_features(h, weights, eps)

    grid = (n_pad // tile, n_pad // tile)
    kernel = functools.partial(_sim_threshold_kernel, threshold=float(threshold))

    cost = pl.CostEstimate(
        flops=int(2 * n_pad * n_pad * k),
        transcendentals=0,
        bytes_accessed=int(4 * (n_pad * n_pad + 2 * n_pad * k)),
    )

    out = pl.pallas_call(
        kernel,
        out_shape=jax.ShapeDtypeStruct((n_pad, n_pad), jnp.float32),
        grid_spec=pltpu.PrefetchScalarGridSpec(
            num_scalar_prefetch=0,
            grid=grid,
            in_specs=[
                pl.BlockSpec((tile, k), lambda i, j: (i, 0)),   # LHS row block (TM, K)
                pl.BlockSpec((k, tile), lambda i, j: (0, j)),   # RHS col block (K, TN)
            ],
            out_specs=pl.BlockSpec((tile, tile), lambda i, j: (i, j)),
        ),
        compiler_params=pltpu.CompilerParams(
            # Shard both output axes across TensorCores (2 TCs on v7x).
            dimension_semantics=("parallel", "parallel"),
            # TILE=1024: ~8 MiB output double-buffer + <1 MiB inputs; 40 MiB
            # leaves headroom everywhere (v7x physical VMEM is 64 MiB).
            vmem_limit_bytes=40 * 1024 * 1024,
        ),
        cost_estimate=cost,
    )(left, right_t)

    # Only slice when N is not 128-aligned (avoids an extra N^2 copy otherwise).
    if n_pad != n:
        out = out[:n, :n]
    return out


def _xavier_uniform(key, shape):
    # nn.init.xavier_uniform_ for shape (1, nhid): fan_in=nhid, fan_out=1
    fan_in, fan_out = shape[1], shape[0]
    bound = (6.0 / (fan_in + fan_out)) ** 0.5
    return jax.random.uniform(key, shape, jnp.float32, minval=-bound, maxval=bound)


def _reference(h, weights, threshold=0.1, eps=1e-8):
    # Pure-JAX reference mirroring the PyTorch module.
    n = h.shape[0]
    num_channel = weights.shape[0]
    s = jnp.zeros((n, n), jnp.float32)
    for i in range(num_channel):
        hw = h * weights[i][None, :]
        norm = jnp.linalg.norm(hw, axis=1, keepdims=True)
        hn = hw / jnp.maximum(norm, eps)
        s = s + hn @ hn.T
    s = s / num_channel
    return jnp.where(s < threshold, jnp.zeros_like(s), s)


if __name__ == "__main__":
    key = jax.random.PRNGKey(0)
    k_h, k_w0, k_w1 = jax.random.split(key, 3)

    N, DIM, NUM_CHANNEL = 16, 32, 2
    h = jax.random.normal(k_h, (N, DIM), jnp.float32)
    # per-channel (1, dim) MetricCalcLayer weights, xavier-uniform, stacked
    w0 = _xavier_uniform(k_w0, (1, DIM))
    w1 = _xavier_uniform(k_w1, (1, DIM))
    weights = jnp.concatenate([w0, w1], axis=0)  # (num_channel, dim)

    out = graph_generator(h, weights, threshold=0.1)
    out = jax.block_until_ready(out)

    ref = _reference(h, weights, threshold=0.1)
    assert out.shape == (N, N)
    assert jnp.allclose(out, ref, atol=1e-5, rtol=1e-5), "mismatch vs reference"

    print("KERNEL_OK")
</pallas_src>

<mosaic_0001>
module attributes {stable_mosaic.version = 11 : i64} {
  func.func @_sim_threshold_kernel(%arg0: i32, %arg1: i32, %arg2: memref<128x64xf32, #tpu.memory_space<vmem>>, %arg3: memref<64x128xf32, #tpu.memory_space<vmem>>, %arg4: memref<128x128xf32, #tpu.memory_space<vmem>>) attributes {dimension_semantics = [#tpu.dimension_semantics<parallel>, #tpu.dimension_semantics<parallel>], iteration_bounds = array<i64: 1, 1>, scalar_prefetch = 0 : i64, scratch_operands = 0 : i64, tpu.core_type = #tpu.core_type<tc>, window_params = [{transform_indices = @transform_0, window_bounds = array<i64: 128, 64>}, {transform_indices = @transform_1, window_bounds = array<i64: 64, 128>}, {transform_indices = @transform_2, window_bounds = array<i64: 128, 128>}]} {
    %c0 = arith.constant 0 : index
    %c0_0 = arith.constant 0 : index
    %0 = vector.load %arg2[%c0, %c0_0] : memref<128x64xf32, #tpu.memory_space<vmem>>, vector<128x64xf32>
    %c0_1 = arith.constant 0 : index
    %c0_2 = arith.constant 0 : index
    %1 = vector.load %arg3[%c0_1, %c0_2] : memref<64x128xf32, #tpu.memory_space<vmem>>, vector<64x128xf32>
    %cst = arith.constant dense<0.000000e+00> : vector<128x128xf32>
    %2 = tpu.matmul %0, %1, %cst {dimension_numbers = #tpu.dot_dimension_numbers<[1], [0], [0], [1], [0, 0, 1, 1], [], []>} : vector<128x64xf32>, vector<64x128xf32>, vector<128x128xf32> -> vector<128x128xf32>
    %cst_3 = arith.constant 1.000000e-01 : f32
    %3 = vector.broadcast %cst_3 : f32 to vector<128x128xf32>
    %4 = arith.cmpf olt, %2, %3 : vector<128x128xf32>
    %cst_4 = arith.constant 0.000000e+00 : f32
    %5 = vector.broadcast %cst_4 : f32 to vector<128x128xf32>
    %6 = arith.select %4, %5, %2 : vector<128x128xi1>, vector<128x128xf32>
    %c0_5 = arith.constant 0 : index
    %c0_6 = arith.constant 0 : index
    %7 = vector.load %arg4[%c0_5, %c0_6] : memref<128x128xf32, #tpu.memory_space<vmem>>, vector<128x128xf32>
    tpu.vector_store %arg4[%c0_5, %c0_6], %6 {strides = array<i32>} : memref<128x128xf32, #tpu.memory_space<vmem>>, vector<128x128xf32>,
    return
  }
  func.func @transform_0(%arg0: i32, %arg1: i32) -> (i32, i32) {
    %c0_i32 = arith.constant 0 : i32
    %c0_i32_0 = arith.constant 0 : i32
    return %arg0, %c0_i32 : i32, i32
  }
  func.func @transform_1(%arg0: i32, %arg1: i32) -> (i32, i32) {
    %c0_i32 = arith.constant 0 : i32
    %c0_i32_0 = arith.constant 0 : i32
    return %c0_i32, %arg1 : i32, i32
  }
  func.func @transform_2(%arg0: i32, %arg1: i32) -> (i32, i32) {
    %c0_i32 = arith.constant 0 : i32
    return %arg0, %arg1 : i32, i32
  }
}

</mosaic_0001>

<bundles_post_ra>
// kernel: graph_generator.1
= control target key start
LH: loop header
LB: loop body
LE: loop exit
PB: predicated region body
PF: predicated region fallthrough
CT: control target
= control target key end

     0   :  { %vm35_vm0 = vcmask 523264   ;;  %s528_s1 = inlined_call_operand.vmem [shape: f32[64,128], index: 1, kind: input, shape index: {}]   ;;  %s529_s0 = inlined_call_operand.vmem [shape: f32[128,64], index: 0, kind: input, shape index: {}]   ;;  %s530_s2 = inlined_call_operand.vmem [shape: f32[128,128], index: 2, kind: output, shape index: {}]  }
   0x1   :  { %v34_v0 = vld [vmem:[%s528_s1 + $0x38] sm:$0xff]  ;;  %v33_v1 = vld [vmem:[%s528_s1 + $0x30] sm:$0xff]  ;;  %v32_v2 = vld [vmem:[%s528_s1 + $0x28] sm:$0xff] }
   0x2   :  { %321 = vmatprep.subr.mxu0 %v34_v0  ;;  %361 = vmatprep.subr.mxu1 %v34_v0  ;;  %v31_v3 = vld [vmem:[%s528_s1 + $0x20] sm:$0xff]  ;;  %v30_v4 = vld [vmem:[%s528_s1 + $0x18] sm:$0xff]  ;;  %v29_v5 = vld [vmem:[%s528_s1 + $0x10] sm:$0xff] }
   0x3   :  { %322 = vmatpush3.msra.mxu0 %v34_v0  ;;  %369 = vmatpush3.msra.mxu1 %v34_v0  ;;  %v28_v6 = vld [vmem:[%s528_s1 + $0x8] sm:$0xff]  ;;  %v27_v7 = vld [vmem:[%s528_s1] sm:$0xff]  ;;  %v13_v12 = vld [vmem:[%s529_s0 + $0x10] sm:$0xff] }
   0x4   :  { %323 = vmatprep.subr.mxu0 %v33_v1  ;;  %362 = vmatprep.subr.mxu1 %v33_v1  ;;  %v11_v8 = vld [vmem:[%s529_s0] sm:$0xff]  ;;  %v12_v10 = vld [vmem:[%s529_s0 + $0x8] sm:$0xff]  ;;  %v21_v13 = vld [vmem:[%s529_s0 + $0x50] sm:$0xff] }
   0x5   :  { %324 = vmatpush3.msra.mxu0 %v33_v1  ;;  %370 = vmatpush3.msra.mxu1 %v33_v1  ;;  %v19_v9 = vld [vmem:[%s529_s0 + $0x40] sm:$0xff]  ;;  %v20_v11 = vld [vmem:[%s529_s0 + $0x48] sm:$0xff]  ;;  %v14_v14 = vld [vmem:[%s529_s0 + $0x18] sm:$0xff] }
   0x6   :  { %325 = vmatprep.subr.mxu0 %v32_v2  ;;  %363 = vmatprep.subr.mxu1 %v32_v2  ;;  %v22_v15 = vld [vmem:[%s529_s0 + $0x58] sm:$0xff]  ;;  %v15_v16 = vld [vmem:[%s529_s0 + $0x20] sm:$0xff]  ;;  %v16_v18 = vld [vmem:[%s529_s0 + $0x28] sm:$0xff] }
   0x7   :  { %326 = vmatpush3.msra.mxu0 %v32_v2  ;;  %371 = vmatpush3.msra.mxu1 %v32_v2  ;;  %v23_v17 = vld [vmem:[%s529_s0 + $0x60] sm:$0xff]  ;;  %v24_v19 = vld [vmem:[%s529_s0 + $0x68] sm:$0xff]  ;;  %v17_v20 = vld [vmem:[%s529_s0 + $0x30] sm:$0xff] }
   0x8   :  { %327 = vmatprep.subr.mxu0 %v31_v3  ;;  %364 = vmatprep.subr.mxu1 %v31_v3  ;;  %v25_v21 = vld [vmem:[%s529_s0 + $0x70] sm:$0xff]  ;;  %v18_v22 = vld [vmem:[%s529_s0 + $0x38] sm:$0xff] }
   0x9   :  { %328 = vmatpush3.msra.mxu0 %v31_v3  ;;  %372 = vmatpush3.msra.mxu1 %v31_v3  ;;  %v26_v23 = vld [vmem:[%s529_s0 + $0x78] sm:$0xff] }
   0xa   :  { %329 = vmatprep.subr.mxu0 %v30_v4  ;;  %365 = vmatprep.subr.mxu1 %v30_v4 }
   0xb   :  { %330 = vmatpush3.msra.mxu0 %v30_v4  ;;  %373 = vmatpush3.msra.mxu1 %v30_v4 }
   0xc   :  { %331 = vmatprep.subr.mxu0 %v29_v5  ;;  %366 = vmatprep.subr.mxu1 %v29_v5 }
   0xd   :  { %332 = vmatpush3.msra.mxu0 %v29_v5  ;;  %374 = vmatpush3.msra.mxu1 %v29_v5 }
   0xe   :  { %333 = vmatprep.subr.mxu0 %v28_v6  ;;  %367 = vmatprep.subr.mxu1 %v28_v6 }
   0xf   :  { %334 = vmatpush3.msra.mxu0 %v28_v6  ;;  %375 = vmatpush3.msra.mxu1 %v28_v6 }
  0x10   :  { %335 = vmatprep.subr.mxu0 %v27_v7  ;;  %368 = vmatprep.subr.mxu1 %v27_v7 }
  0x11   :  { %336 = vmatpush3.msra.mxu0 %v27_v7  ;;  %376 = vmatpush3.msra.mxu1 %v27_v7 }
  0x12   :  { %337 = vmatprep.mubr.msk.f32.mxu0 %vm35_vm0, %v11_v8  ;;  %349 = vmatprep.mubr.msk.f32.mxu1 %vm35_vm0, %v19_v9 }
  0x13   :  { %338 = vmatmul.mubr.msk.f32.vlgmr.msra.gmra.mxu0 %vm35_vm0, %v12_v10  ;;  %350 = vmatmul.mubr.msk.f32.vlgmr.msra.gmra.mxu1 %vm35_vm0, %v20_v11 }
  0x14   :  { %340 = vmatprep.mubr.msk.f32.mxu0 %vm35_vm0, %v13_v12  ;;  %352 = vmatprep.mubr.msk.f32.mxu1 %vm35_vm0, %v21_v13 }
  0x17   :  { %341 = vmatmul.mubr.msk.f32.gmra.mxu0 %vm35_vm0, %v14_v14  ;;  %353 = vmatmul.mubr.msk.f32.gmra.mxu1 %vm35_vm0, %v22_v15 }
  0x18   :  { %343 = vmatprep.mubr.msk.f32.mxu0 %vm35_vm0, %v15_v16  ;;  %355 = vmatprep.mubr.msk.f32.mxu1 %vm35_vm0, %v23_v17 }
  0x1b   :  { %344 = vmatmul.mubr.msk.f32.gmra.mxu0 %vm35_vm0, %v16_v18  ;;  %356 = vmatmul.mubr.msk.f32.gmra.mxu1 %vm35_vm0, %v24_v19 }
  0x1c   :  { %346 = vmatprep.mubr.msk.f32.mxu0 %vm35_vm0, %v17_v20  ;;  %358 = vmatprep.mubr.msk.f32.mxu1 %vm35_vm0, %v25_v21 }
  0x1f   :  { %347 = vmatmul.mubr.msk.f32.gmra.mxu0 %vm35_vm0, %v18_v22  ;;  %359 = vmatmul.mubr.msk.f32.gmra.mxu1 %vm35_vm0, %v26_v23 }
  0xd3   :  { %v339_v24 = vpop.f32.mrf.mxu0  ;;  %v351_v25 = vpop.f32.mrf.mxu1 }
  0xd4   :  { %vm230_vm1 = vcmp.lt.f32.partialorder %v339_v24, 0.1  ;;  %vm238_vm2 = vcmp.lt.f32.partialorder %v351_v25, 0.1 }
  0xd5   :  { %v246_v26 = vsel %vm230_vm1, 0.0, %v339_v24  ;;  %v254_v27 = vsel %vm238_vm2, 0.0, %v351_v25  ;;  %v150_v28 = vpop.f32.mrf.mxu0  ;;  %v190_v29 = vpop.f32.mrf.mxu1 }
  0xd6   :  { %262 = vst [vmem:[%s530_s2 + $0x8] sm:$0xff] %v246_v26  ;;  %270 = vst [vmem:[%s530_s2 + $0x48] sm:$0xff] %v254_v27  ;;  %vm229_vm3 = vcmp.lt.f32.partialorder %v150_v28, 0.1  ;;  %vm237_vm4 = vcmp.lt.f32.partialorder %v190_v29, 0.1 }
  0xd7   :  { %v245_v30 = vsel %vm229_vm3, 0.0, %v150_v28  ;;  %v253_v31 = vsel %vm237_vm4, 0.0, %v190_v29  ;;  %v342_v32 = vpop.f32.mrf.mxu0  ;;  %v354_v33 = vpop.f32.mrf.mxu1 }
  0xd8   :  { %261 = vst [vmem:[%s530_s2] sm:$0xff] %v245_v30  ;;  %269 = vst [vmem:[%s530_s2 + $0x40] sm:$0xff] %v253_v31  ;;  %vm232_vm5 = vcmp.lt.f32.partialorder %v342_v32, 0.1  ;;  %vm240_vm6 = vcmp.lt.f32.partialorder %v354_v33, 0.1 }
  0xd9   :  { %v248_v34 = vsel %vm232_vm5, 0.0, %v342_v32  ;;  %v256_v35 = vsel %vm240_vm6, 0.0, %v354_v33  ;;  %v160_v36 = vpop.f32.mrf.mxu0  ;;  %v200_v37 = vpop.f32.mrf.mxu1 }
  0xda   :  { %264 = vst [vmem:[%s530_s2 + $0x18] sm:$0xff] %v248_v34  ;;  %272 = vst [vmem:[%s530_s2 + $0x58] sm:$0xff] %v256_v35  ;;  %vm231_vm7 = vcmp.lt.f32.partialorder %v160_v36, 0.1  ;;  %vm239_vm8 = vcmp.lt.f32.partialorder %v200_v37, 0.1 }
  0xdb   :  { %v247_v38 = vsel %vm231_vm7, 0.0, %v160_v36  ;;  %v255_v39 = vsel %vm239_vm8, 0.0, %v200_v37  ;;  %v345_v40 = vpop.f32.mrf.mxu0  ;;  %v357_v41 = vpop.f32.mrf.mxu1 }
  0xdc   :  { %263 = vst [vmem:[%s530_s2 + $0x10] sm:$0xff] %v247_v38  ;;  %271 = vst [vmem:[%s530_s2 + $0x50] sm:$0xff] %v255_v39  ;;  %vm234_vm9 = vcmp.lt.f32.partialorder %v345_v40, 0.1  ;;  %vm242_vm10 = vcmp.lt.f32.partialorder %v357_v41, 0.1 }
  0xdd   :  { %v250_v42 = vsel %vm234_vm9, 0.0, %v345_v40  ;;  %v258_v43 = vsel %vm242_vm10, 0.0, %v357_v41  ;;  %v170_v44 = vpop.f32.mrf.mxu0  ;;  %v210_v45 = vpop.f32.mrf.mxu1 }
  0xde   :  { %266 = vst [vmem:[%s530_s2 + $0x28] sm:$0xff] %v250_v42  ;;  %274 = vst [vmem:[%s530_s2 + $0x68] sm:$0xff] %v258_v43  ;;  %vm233_vm11 = vcmp.lt.f32.partialorder %v170_v44, 0.1  ;;  %vm241_vm12 = vcmp.lt.f32.partialorder %v210_v45, 0.1 }
  0xdf   :  { %v249_v46 = vsel %vm233_vm11, 0.0, %v170_v44  ;;  %v257_v47 = vsel %vm241_vm12, 0.0, %v210_v45  ;;  %v348_v48 = vpop.f32.mrf.mxu0  ;;  %v360_v49 = vpop.f32.mrf.mxu1 }
  0xe0   :  { %265 = vst [vmem:[%s530_s2 + $0x20] sm:$0xff] %v249_v46  ;;  %273 = vst [vmem:[%s530_s2 + $0x60] sm:$0xff] %v257_v47  ;;  %vm236_vm13 = vcmp.lt.f32.partialorder %v348_v48, 0.1  ;;  %vm244_vm14 = vcmp.lt.f32.partialorder %v360_v49, 0.1 }
  0xe1   :  { %v252_v50 = vsel %vm236_vm13, 0.0, %v348_v48  ;;  %v260_v51 = vsel %vm244_vm14, 0.0, %v360_v49  ;;  %v180_v52 = vpop.f32.mrf.mxu0  ;;  %v220_v53 = vpop.f32.mrf.mxu1 }
  0xe2   :  { %268 = vst [vmem:[%s530_s2 + $0x38] sm:$0xff] %v252_v50  ;;  %276 = vst [vmem:[%s530_s2 + $0x78] sm:$0xff] %v260_v51  ;;  %vm235_vm15 = vcmp.lt.f32.partialorder %v180_v52, 0.1  ;;  %vm243_vm0 = vcmp.lt.f32.partialorder %v220_v53, 0.1 }
  0xe3   :  { %v251_v54 = vsel %vm235_vm15, 0.0, %v180_v52  ;;  %v259_v55 = vsel %vm243_vm0, 0.0, %v220_v53 }
  0xe4   :  { %267 = vst [vmem:[%s530_s2 + $0x30] sm:$0xff] %v251_v54  ;;  %275 = vst [vmem:[%s530_s2 + $0x70] sm:$0xff] %v259_v55 }

</bundles_post_ra>
